<compile_context>
chip_gen: v7x
topology: tpu7x:2x2x1
jax: 0.10.0
libtpu: 0.0.40
codegen_flags: <defaults>
</compile_context>

<pallas_src>
import functools
import math

import jax
import jax.numpy as jnp
from jax import lax
from jax.experimental import pallas as pl
from jax.experimental.pallas import tpu as pltpu


_LANE = 512            # lane-dense last dim (multiple of 128)
_SUB = 8               # sublane tile
_MAX_TILE_ROWS = 512   # 512 x 512 f32 = 1 MiB/slab/buffer; 4 slabs -> 8 MiB dbuf
_HALF_LOG_2PI = 0.5 * math.log(2.0 * math.pi)


# ---------------------------------------------------------------------------
# lgamma(z) for z > 0, f32 accuracy, overflow-safe:
#   z >= 4 : Stirling with 3 correction terms (abs err < 4e-8 at z=4)
#   z <  4 : lgamma(z) = Stirling(z+4) - log(z (z+1) (z+2) (z+3))
# Cost: 2 logs + 1 approx-reciprocal on the EUP, small Horner on the VPU.
# ---------------------------------------------------------------------------
def _lgamma_pos(z):
    small = z < 4.0
    s = jnp.where(small, z + 4.0, z)               # s >= 4 always
    ls = jnp.log(s)
    r = pl.reciprocal(s, approx=True)
    r = r * (2.0 - s * r)                           # one Newton step (VPU only)
    r2 = r * r
    corr = r * (1.0 / 12.0 - r2 * (1.0 / 360.0 - r2 * (1.0 / 1260.0)))
    stirling = (s - 0.5) * ls - s + _HALF_LOG_2PI + corr
    # Shift term for the z < 4 branch (product < 840 there -> no overflow;
    # the large-z value of this log is discarded by the select).
    prod = z * (z + 1.0) * (z + 2.0) * (z + 3.0)
    shift = jnp.where(small, jnp.log(prod), 0.0)
    return stirling - shift


# ---------------------------------------------------------------------------
# Pallas kernel: elementwise Bernoulli-Gamma NLL on one (tile_sub, 8, LANE)
# tile; writes a lane-dense (8, LANE) partial sum to its own output block.
# ---------------------------------------------------------------------------
def _bgl_kernel(true_ref, pred_ref, out_ref, *,
                epsilon, tile_elems, valid_last, needs_mask):
    true = true_ref[...].astype(jnp.float32)                 # (g, 8, LANE)
    occurrence = pred_ref[0].astype(jnp.float32)             # static slice
    shape_parameter = jnp.exp(pred_ref[1].astype(jnp.float32))
    scale_parameter = jnp.exp(pred_ref[2].astype(jnp.float32))

    rain = true > 0.0
    bool_rain = rain.astype(jnp.float32)

    scale_e = scale_parameter + epsilon
    inv_scale = pl.reciprocal(scale_e, approx=True)
    inv_scale = inv_scale * (2.0 - scale_e * inv_scale)      # Newton step

    # Only one of the two occurrence logs is ever used -> select, then one log.
    log_occ = jnp.log(jnp.where(rain, occurrence + epsilon,
                                1.0 - occurrence + epsilon))
    rain_rest = ((shape_parameter - 1.0) * jnp.log(true + epsilon)
                 - shape_parameter * jnp.log(scale_e)
                 - _lgamma_pos(shape_parameter + epsilon)
                 - true * inv_scale)
    term = log_occ + bool_rain * rain_rest

    if needs_mask:
        # Padding exists only in the last tile; tile-local indices stay far
        # below int32 range regardless of the global element count.
        shp3 = term.shape
        grp = lax.broadcasted_iota(jnp.int32, shp3, 0)
        sub = lax.broadcasted_iota(jnp.int32, shp3, 1)
        lni = lax.broadcasted_iota(jnp.int32, shp3, 2)
        local_idx = (grp * _SUB + sub) * _LANE + lni
        limit = jnp.where(pl.program_id(0) == pl.num_programs(0) - 1,
                          valid_last, tile_elems)
        term = jnp.where(local_idx < limit, term, 0.0)

    # Lane-dense per-tile partial sum (pure vreg adds along the leading axis);
    # the final scalar reduce happens outside the kernel.
    out_ref[...] = jnp.sum(term, axis=0)


def bernoulli_gamma_loss(true, pred, last_connection, epsilon=1e-6):
    """JAX/Pallas equivalent of BernoulliGammaLoss.forward(true, pred)."""
    if last_connection == "dense":
        N = pred.shape[0]
        D = pred.shape[1] // 3
        # [N, 3D] -> (3, N*D), matching true.reshape(-1)'s (N, D) flatten order.
        pred3 = jnp.transpose(pred.reshape(N, 3, D), (1, 0, 2)).reshape(3, -1)
    elif last_connection == "conv":
        # pred is [3, C, H, W]; leading-axis split is a free reshape.
        pred3 = pred.reshape(3, -1)
    else:
        raise ValueError("Invalid value for last_connection. Use 'dense' or 'conv'.")

    total = int(true.size)

    rows = -(-total // _LANE)                               # ceil-div
    tile_rows = min(_MAX_TILE_ROWS, -(-rows // _SUB) * _SUB)
    grid_rows = -(-rows // tile_rows)
    padded_rows = grid_rows * tile_rows
    padded_total = padded_rows * _LANE
    pad = padded_total - total
    tile_sub = tile_rows // _SUB
    tile_elems = tile_rows * _LANE
    valid_last = total - (grid_rows - 1) * tile_elems

    true_flat = true.reshape(-1)
    if pad:
        true_flat = jnp.pad(true_flat, (0, pad))
        pred3 = jnp.pad(pred3, ((0, 0), (0, pad)))
    true3 = true_flat.reshape(padded_rows // _SUB, _SUB, _LANE)
    pred4 = pred3.reshape(3, padded_rows // _SUB, _SUB, _LANE)

    kernel = functools.partial(
        _bgl_kernel,
        epsilon=float(epsilon),
        tile_elems=tile_elems,
        valid_last=valid_last,
        needs_mask=(pad != 0),
    )

    partials = pl.pallas_call(
        kernel,
        out_shape=jax.ShapeDtypeStruct((grid_rows * _SUB, _LANE), jnp.float32),
        grid=(grid_rows,),
        in_specs=[
            pl.BlockSpec((tile_sub, _SUB, _LANE), lambda i: (i, 0, 0)),
            pl.BlockSpec((3, tile_sub, _SUB, _LANE), lambda i: (0, i, 0, 0)),
        ],
        out_specs=pl.BlockSpec((_SUB, _LANE), lambda i: (i, 0)),
        compiler_params=pltpu.CompilerParams(
            dimension_semantics=("parallel",),
            vmem_limit_bytes=32 * 1024 * 1024,
        ),
    )(true3, pred4)

    return -(jnp.sum(partials, dtype=jnp.float32) / jnp.float32(total))


# ---------------------------------------------------------------------------
# Pure-JAX reference (for correctness check only).
# ---------------------------------------------------------------------------
def reference_loss(true, pred, last_connection, epsilon=1e-6):
    if last_connection == "dense":
        D = pred.shape[1] // 3
        occurrence = pred[:, :D]
        shape_parameter = jnp.exp(pred[:, D:2 * D])
        scale_parameter = jnp.exp(pred[:, 2 * D:])
    else:
        occurrence = pred[0, ...]
        shape_parameter = jnp.exp(pred[1, ...])
        scale_parameter = jnp.exp(pred[2, ...])
    bool_rain = (true > 0).astype(jnp.float32)
    term = (1 - bool_rain) * jnp.log(1 - occurrence + epsilon) + bool_rain * (
        jnp.log(occurrence + epsilon)
        + (shape_parameter - 1) * jnp.log(true + epsilon)
        - shape_parameter * jnp.log(scale_parameter + epsilon)
        - jax.scipy.special.gammaln(shape_parameter + epsilon)
        - true / (scale_parameter + epsilon)
    )
    return -jnp.mean(term)


if __name__ == "__main__":
    key = jax.random.PRNGKey(0)
    k1, k2, k3, k4, k5, k6 = jax.random.split(key, 6)

    # --- 'conv' mode: pred [3, C, H, W], true [C, H, W] ---
    C, H, W = 4, 16, 16
    occ_conv = jax.nn.sigmoid(jax.random.normal(k1, (1, C, H, W), jnp.float32))
    rest_conv = 0.5 * jax.random.normal(k2, (2, C, H, W), jnp.float32)
    pred_conv = jnp.concatenate([occ_conv, rest_conv], axis=0)
    true_conv = jnp.maximum(jax.random.normal(k3, (C, H, W), jnp.float32), 0.0)

    loss_conv = bernoulli_gamma_loss(true_conv, pred_conv, "conv")
    jax.block_until_ready(loss_conv)
    ref_conv = reference_loss(true_conv, pred_conv, "conv")
    assert jnp.allclose(loss_conv, ref_conv, rtol=1e-3, atol=1e-3), (loss_conv, ref_conv)

    # --- 'dense' mode: pred [N, 3*D], true [N, D] ---
    N, D = 2, 32
    occ_dense = jax.nn.sigmoid(jax.random.normal(k4, (N, D), jnp.float32))
    rest_dense = 0.5 * jax.random.normal(k5, (N, 2 * D), jnp.float32)
    pred_dense = jnp.concatenate([occ_dense, rest_dense], axis=1)
    true_dense = jnp.maximum(jax.random.normal(k6, (N, D), jnp.float32), 0.0)

    loss_dense = bernoulli_gamma_loss(true_dense, pred_dense, "dense")
    jax.block_until_ready(loss_dense)
    ref_dense = reference_loss(true_dense, pred_dense, "dense")
    assert jnp.allclose(loss_dense, ref_dense, rtol=1e-3, atol=1e-3), (loss_dense, ref_dense)

    print("KERNEL_OK")
</pallas_src>

<mosaic_0001>
module attributes {stable_mosaic.version = 11 : i64} {
  func.func @_bgl_kernel(%arg0: i32, %arg1: memref<1x8x512xf32, #tpu.memory_space<vmem>>, %arg2: memref<3x1x8x512xf32, #tpu.memory_space<vmem>>, %arg3: memref<8x512xf32, #tpu.memory_space<vmem>>) attributes {dimension_semantics = [#tpu.dimension_semantics<parallel>], iteration_bounds = array<i64: 1>, scalar_prefetch = 0 : i64, scratch_operands = 0 : i64, tpu.core_type = #tpu.core_type<tc>, window_params = [{transform_indices = @transform_0, window_bounds = array<i64: 1, 8, 512>}, {transform_indices = @transform_1, window_bounds = array<i64: 3, 1, 8, 512>}, {transform_indices = @transform_2, window_bounds = array<i64: 8, 512>}]} {
    %c0 = arith.constant 0 : index
    %c0_0 = arith.constant 0 : index
    %c0_1 = arith.constant 0 : index
    %0 = vector.load %arg1[%c0, %c0_0, %c0_1] : memref<1x8x512xf32, #tpu.memory_space<vmem>>, vector<1x8x512xf32>
    %c0_2 = arith.constant 0 : index
    %c0_3 = arith.constant 0 : index
    %c0_4 = arith.constant 0 : index
    %c0_5 = arith.constant 0 : index
    %1 = vector.load %arg2[%c0_2, %c0_3, %c0_4, %c0_5] : memref<3x1x8x512xf32, #tpu.memory_space<vmem>>, vector<1x1x8x512xf32>
    %2 = vector.shape_cast %1 : vector<1x1x8x512xf32> to vector<1x8x512xf32>
    %c1 = arith.constant 1 : index
    %c0_6 = arith.constant 0 : index
    %c0_7 = arith.constant 0 : index
    %c0_8 = arith.constant 0 : index
    %3 = vector.load %arg2[%c1, %c0_6, %c0_7, %c0_8] : memref<3x1x8x512xf32, #tpu.memory_space<vmem>>, vector<1x1x8x512xf32>
    %4 = vector.shape_cast %3 : vector<1x1x8x512xf32> to vector<1x8x512xf32>
    %5 = math.exp %4 : vector<1x8x512xf32>
    %c2 = arith.constant 2 : index
    %c0_9 = arith.constant 0 : index
    %c0_10 = arith.constant 0 : index
    %c0_11 = arith.constant 0 : index
    %6 = vector.load %arg2[%c2, %c0_9, %c0_10, %c0_11] : memref<3x1x8x512xf32, #tpu.memory_space<vmem>>, vector<1x1x8x512xf32>
    %7 = vector.shape_cast %6 : vector<1x1x8x512xf32> to vector<1x8x512xf32>
    %8 = math.exp %7 : vector<1x8x512xf32>
    %cst = arith.constant 0.000000e+00 : f32
    %9 = vector.broadcast %cst : f32 to vector<1x8x512xf32>
    %10 = arith.cmpf ogt, %0, %9 : vector<1x8x512xf32>
    %11 = arith.extui %10 : vector<1x8x512xi1> to vector<1x8x512xi32>
    %12 = arith.sitofp %11 : vector<1x8x512xi32> to vector<1x8x512xf32>
    %cst_12 = arith.constant 9.99999997E-7 : f32
    %13 = vector.broadcast %cst_12 : f32 to vector<1x8x512xf32>
    %14 = arith.addf %8, %13 : vector<1x8x512xf32>
    %15 = tpu.reciprocal %14 {approx = true} : vector<1x8x512xf32> -> vector<1x8x512xf32>
    %16 = arith.mulf %14, %15 : vector<1x8x512xf32>
    %cst_13 = arith.constant 2.000000e+00 : f32
    %17 = vector.broadcast %cst_13 : f32 to vector<1x8x512xf32>
    %18 = arith.subf %17, %16 : vector<1x8x512xf32>
    %19 = arith.mulf %15, %18 : vector<1x8x512xf32>
    %cst_14 = arith.constant 9.99999997E-7 : f32
    %20 = vector.broadcast %cst_14 : f32 to vector<1x8x512xf32>
    %21 = arith.addf %2, %20 : vector<1x8x512xf32>
    %cst_15 = arith.constant 1.000000e+00 : f32
    %22 = vector.broadcast %cst_15 : f32 to vector<1x8x512xf32>
    %23 = arith.subf %22, %2 : vector<1x8x512xf32>
    %cst_16 = arith.constant 9.99999997E-7 : f32
    %24 = vector.broadcast %cst_16 : f32 to vector<1x8x512xf32>
    %25 = arith.addf %23, %24 : vector<1x8x512xf32>
    %26 = arith.select %10, %21, %25 : vector<1x8x512xi1>, vector<1x8x512xf32>
    %27 = math.log %26 : vector<1x8x512xf32>
    %cst_17 = arith.constant 1.000000e+00 : f32
    %28 = vector.broadcast %cst_17 : f32 to vector<1x8x512xf32>
    %29 = arith.subf %5, %28 : vector<1x8x512xf32>
    %cst_18 = arith.constant 9.99999997E-7 : f32
    %30 = vector.broadcast %cst_18 : f32 to vector<1x8x512xf32>
    %31 = arith.addf %0, %30 : vector<1x8x512xf32>
    %32 = math.log %31 : vector<1x8x512xf32>
    %33 = arith.mulf %29, %32 : vector<1x8x512xf32>
    %34 = math.log %14 : vector<1x8x512xf32>
    %35 = arith.mulf %5, %34 : vector<1x8x512xf32>
    %36 = arith.subf %33, %35 : vector<1x8x512xf32>
    %cst_19 = arith.constant 9.99999997E-7 : f32
    %37 = vector.broadcast %cst_19 : f32 to vector<1x8x512xf32>
    %38 = arith.addf %5, %37 : vector<1x8x512xf32>
    %cst_20 = arith.constant 4.000000e+00 : f32
    %39 = vector.broadcast %cst_20 : f32 to vector<1x8x512xf32>
    %40 = arith.cmpf olt, %38, %39 : vector<1x8x512xf32>
    %cst_21 = arith.constant 4.000000e+00 : f32
    %41 = vector.broadcast %cst_21 : f32 to vector<1x8x512xf32>
    %42 = arith.addf %38, %41 : vector<1x8x512xf32>
    %43 = arith.select %40, %42, %38 : vector<1x8x512xi1>, vector<1x8x512xf32>
    %44 = math.log %43 : vector<1x8x512xf32>
    %45 = tpu.reciprocal %43 {approx = true} : vector<1x8x512xf32> -> vector<1x8x512xf32>
    %46 = arith.mulf %43, %45 : vector<1x8x512xf32>
    %cst_22 = arith.constant 2.000000e+00 : f32
    %47 = vector.broadcast %cst_22 : f32 to vector<1x8x512xf32>
    %48 = arith.subf %47, %46 : vector<1x8x512xf32>
    %49 = arith.mulf %45, %48 : vector<1x8x512xf32>
    %50 = arith.mulf %49, %49 : vector<1x8x512xf32>
    %cst_23 = arith.constant 7.93650805E-4 : f32
    %51 = vector.broadcast %cst_23 : f32 to vector<1x8x512xf32>
    %52 = arith.mulf %50, %51 : vector<1x8x512xf32>
    %cst_24 = arith.constant 0.00277777785 : f32
    %53 = vector.broadcast %cst_24 : f32 to vector<1x8x512xf32>
    %54 = arith.subf %53, %52 : vector<1x8x512xf32>
    %55 = arith.mulf %50, %54 : vector<1x8x512xf32>
    %cst_25 = arith.constant 0.0833333358 : f32
    %56 = vector.broadcast %cst_25 : f32 to vector<1x8x512xf32>
    %57 = arith.subf %56, %55 : vector<1x8x512xf32>
    %58 = arith.mulf %49, %57 : vector<1x8x512xf32>
    %cst_26 = arith.constant 5.000000e-01 : f32
    %59 = vector.broadcast %cst_26 : f32 to vector<1x8x512xf32>
    %60 = arith.subf %43, %59 : vector<1x8x512xf32>
    %61 = arith.mulf %60, %44 : vector<1x8x512xf32>
    %62 = arith.subf %61, %43 : vector<1x8x512xf32>
    %cst_27 = arith.constant 0.918938517 : f32
    %63 = vector.broadcast %cst_27 : f32 to vector<1x8x512xf32>
    %64 = arith.addf %62, %63 : vector<1x8x512xf32>
    %65 = arith.addf %64, %58 : vector<1x8x512xf32>
    %cst_28 = arith.constant 1.000000e+00 : f32
    %66 = vector.broadcast %cst_28 : f32 to vector<1x8x512xf32>
    %67 = arith.addf %38, %66 : vector<1x8x512xf32>
    %68 = arith.mulf %38, %67 : vector<1x8x512xf32>
    %cst_29 = arith.constant 2.000000e+00 : f32
    %69 = vector.broadcast %cst_29 : f32 to vector<1x8x512xf32>
    %70 = arith.addf %38, %69 : vector<1x8x512xf32>
    %71 = arith.mulf %68, %70 : vector<1x8x512xf32>
    %cst_30 = arith.constant 3.000000e+00 : f32
    %72 = vector.broadcast %cst_30 : f32 to vector<1x8x512xf32>
    %73 = arith.addf %38, %72 : vector<1x8x512xf32>
    %74 = arith.mulf %71, %73 : vector<1x8x512xf32>
    %75 = math.log %74 : vector<1x8x512xf32>
    %cst_31 = arith.constant 0.000000e+00 : f32
    %76 = vector.broadcast %cst_31 : f32 to vector<1x8x512xf32>
    %77 = arith.select %40, %75, %76 : vector<1x8x512xi1>, vector<1x8x512xf32>
    %78 = arith.subf %65, %77 : vector<1x8x512xf32>
    %79 = arith.subf %36, %78 : vector<1x8x512xf32>
    %80 = arith.mulf %0, %19 : vector<1x8x512xf32>
    %81 = arith.subf %79, %80 : vector<1x8x512xf32>
    %82 = arith.mulf %12, %81 : vector<1x8x512xf32>
    %83 = arith.addf %27, %82 : vector<1x8x512xf32>
    %84 = tpu.iota {dimensions = array<i32: 0>} : vector<1x8x512xi32>
    %85 = tpu.iota {dimensions = array<i32: 1>} : vector<1x8x512xi32>
    %86 = tpu.iota {dimensions = array<i32: 2>} : vector<1x8x512xi32>
    %c8_i32 = arith.constant 8 : i32
    %87 = vector.broadcast %c8_i32 : i32 to vector<1x8x512xi32>
    %88 = arith.muli %84, %87 : vector<1x8x512xi32>
    %89 = arith.addi %88, %85 : vector<1x8x512xi32>
    %c512_i32 = arith.constant 512 : i32
    %90 = vector.broadcast %c512_i32 : i32 to vector<1x8x512xi32>
    %91 = arith.muli %89, %90 : vector<1x8x512xi32>
    %92 = arith.addi %91, %86 : vector<1x8x512xi32>
    %c0_i32 = arith.constant 0 : i32
    %93 = arith.cmpi eq, %arg0, %c0_i32 : i32
    %c1024_i32 = arith.constant 1024 : i32
    %c4096_i32 = arith.constant 4096 : i32
    %94 = arith.select %93, %c1024_i32, %c4096_i32 : i32
    %95 = vector.broadcast %94 : i32 to vector<1x8x512xi32>
    %96 = arith.cmpi slt, %92, %95 : vector<1x8x512xi32>
    %cst_32 = arith.constant 0.000000e+00 : f32
    %97 = vector.broadcast %cst_32 : f32 to vector<1x8x512xf32>
    %98 = arith.select %96, %83, %97 : vector<1x8x512xi1>, vector<1x8x512xf32>
    %cst_33 = arith.constant dense<0.000000e+00> : vector<8x512xf32>
    %99 = vector.multi_reduction <add>, %98, %cst_33 [0] : vector<1x8x512xf32> to vector<8x512xf32>
    %c0_34 = arith.constant 0 : index
    %c0_35 = arith.constant 0 : index
    %100 = vector.load %arg3[%c0_34, %c0_35] : memref<8x512xf32, #tpu.memory_space<vmem>>, vector<8x512xf32>
    tpu.vector_store %arg3[%c0_34, %c0_35], %99 {strides = array<i32>} : memref<8x512xf32, #tpu.memory_space<vmem>>, vector<8x512xf32>,
    return
  }
  func.func @transform_0(%arg0: i32) -> (i32, i32, i32) {
    %c0_i32 = arith.constant 0 : i32
    %c0_i32_0 = arith.constant 0 : i32
    %c0_i32_1 = arith.constant 0 : i32
    return %arg0, %c0_i32, %c0_i32_0 : i32, i32, i32
  }
  func.func @transform_1(%arg0: i32) -> (i32, i32, i32, i32) {
    %c0_i32 = arith.constant 0 : i32
    %c0_i32_0 = arith.constant 0 : i32
    %c0_i32_1 = arith.constant 0 : i32
    %c0_i32_2 = arith.constant 0 : i32
    return %c0_i32, %arg0, %c0_i32_0, %c0_i32_1 : i32, i32, i32, i32
  }
  func.func @transform_2(%arg0: i32) -> (i32, i32) {
    %c0_i32 = arith.constant 0 : i32
    %c0_i32_0 = arith.constant 0 : i32
    return %arg0, %c0_i32 : i32, i32
  }
}

</mosaic_0001>

<bundles_post_ra>
// kernel: tpu_custom_call.1
= control target key start
LH: loop header
LB: loop body
LE: loop exit
PB: predicated region body
PF: predicated region fallthrough
CT: control target
= control target key end

     0   :  { %7 = vsyncpa [#allocation3], 0  ;;  %s798_s0 = inlined_call_operand.hbm [shape: f32[1,8,512], index: 0, kind: input, shape index: {}]   ;;  %s799_s1 = inlined_call_operand.hbm [shape: f32[3,1,8,512], index: 1, kind: input, shape index: {}]   ;;  %s800_s2 = inlined_call_operand.hbm [shape: f32[8,512], index: 2, kind: output, shape index: {}]  }
   0x1   :  { %8 = vsyncpa [#allocation6], 0 }
   0x2   :  { %9 = vsyncpa [#allocation4], 0  ;;  %s517_s9 = smov [#allocation2]   ;;  %s518_s11 = smov [#allocation5]  }
   0x3   :  { %s16_s10 = sshll.u32 %s517_s9, 4  ;;  %s25_s12 = sshll.u32 %s518_s11, 4  ;;  %s17_s10 = int_to_ptr.vmem [resolvable:$true] %s16_s10  ;;  %s538_s12 = int_to_ptr.vmem [resolvable:$true] %s25_s12 }
   0x4   :  { %s445_s15 = scalar_lea.hbm %s798_s0, 512 }
   0x5   :  { %p446_p0 = scmp.ne.s32.totalorder %s798_s0, %s445_s15  ;;  %p449_p1 = scmp.lt.u32.totalorder %s445_s15, %s798_s0 }
   0x7   :  { %p451_p2 = pnand %p449_p1, %p446_p0 }
   0x9   :  { %454 = shalt.err (!%p451_p2)
}
   0xa   :  { %s455_s20 = scalar_lea.vmem %s17_s10, 512  ;;  %p460_p4 = scmp.lt.s32.totalorder %s17_s10, %s17_s10 }
   0xb   :  { %p456_p3 = scmp.ne.s32.totalorder %s17_s10, %s455_s20  ;;  %p461_p5 = scmp.lt.s32.totalorder %s455_s20, %s455_s20 }
   0xd   :  { %p462_p6 = por %p461_p5, %p460_p4 }
   0xf   :  { %p463_p7 = pnand %p462_p6, %p456_p3 }
  0x11   :  { %466 = shalt.err (!%p463_p7)
}
  0x12   :  { %19 = dma.hbm_to_vmem [thread:$0]  %s798_s0, 512, %s17_s10, [#allocation3]  }
  0x13   :  { %s467_s25 = scalar_lea.hbm %s799_s1, 1536 }
  0x14   :  { %p468_p8 = scmp.ne.s32.totalorder %s799_s1, %s467_s25  ;;  %p471_p9 = scmp.lt.u32.totalorder %s467_s25, %s799_s1 }
  0x16   :  { %p473_p10 = pnand %p471_p9, %p468_p8 }
  0x18   :  { %476 = shalt.err (!%p473_p10)
}
  0x19   :  { %s477_s30 = scalar_lea.vmem %s538_s12, 1536  ;;  %p482_p12 = scmp.lt.s32.totalorder %s538_s12, %s538_s12 }
  0x1a   :  { %p478_p11 = scmp.ne.s32.totalorder %s538_s12, %s477_s30  ;;  %p483_p13 = scmp.lt.s32.totalorder %s477_s30, %s477_s30 }
  0x1c   :  { %p484_p0 = por %p483_p13, %p482_p12 }
  0x1e   :  { %p485_p1 = pnand %p484_p0, %p478_p11 }
  0x20   :  { %488 = shalt.err (!%p485_p1)
}
  0x21   :  { %s519_s0 = smov 512   ;;  %s520_s3 = smov 32  }
  0x22   :  { %31 = dma.hbm_to_vmem [thread:$0]  %s799_s1, 1536, %s538_s12, [#allocation6], %s519_s0, %s519_s0, %s520_s3  }
  0x23   :  { %511 = dma.done.wait [#allocation3], 512  }
  0x24   :  { %512 = vsyncadd [#allocation3], 4294966784 }
  0x25   :  { %513 = dma.done.wait [#allocation6], 1536  }
  0x26   :  { %514 = vsyncadd [#allocation6], 4294965760  ;;  %v42_v0 = vld [vmem:[#allocation5] sm:$0xff]  ;;  %v43_v6 = vld [vmem:[#allocation5 + $0x8] sm:$0xff]  ;;  %v308_v31 = vlaneseq  ;;  %s522_s1 = smov [#allocation7]  }
  0x27   :  { %v47_v1 = vld [vmem:[#allocation5 + $0x20] sm:$0xff]  ;;  %v108_v5 = vsub.f32 1.0, %v42_v0  ;;  %v48_v7 = vld [vmem:[#allocation5 + $0x28] sm:$0xff]  ;;  %v109_v12 = vsub.f32 1.0, %v43_v6  ;;  %v49_v13 = vld [vmem:[#allocation5 + $0x30] sm:$0xff]  ;;  %s345_s6 = sshll.u32 %s522_s1, 4  ;;  %s346_s6 = int_to_ptr.vmem [resolvable:$true] %s345_s6 }
  0x28   :  { %v51_v2 = vmul.f32 1.442695, %v47_v1  ;;  %v60_v3 = vld [vmem:[#allocation5 + $0x40] sm:$0xff]  ;;  %v53_v8 = vmul.f32 1.442695, %v48_v7  ;;  %v61_v9 = vld [vmem:[#allocation5 + $0x48] sm:$0xff]  ;;  %p494_p3 = scmp.lt.s32.totalorder %s346_s6, %s346_s6 }
  0x29   :  { %v64_v4 = vmul.f32 1.442695, %v60_v3  ;;  %v66_v10 = vmul.f32 1.442695, %v61_v9  ;;  %v569_v11 = vld [vmem:[#allocation2] sm:$0xff]  ;;  %v572_v17 = vld [vmem:[#allocation2 + $0x8] sm:$0xff] }
  0x2a   :  { %373 = vpow2.f32 %v51_v2  ;;  %v104_v14 = vadd.f32 1e-06, %v42_v0  ;;  %v112_v15 = vadd.f32 1e-06, %v108_v5  ;;  %v55_v16 = vmul.f32 1.442695, %v49_v13 }
  0x2b   :  { %375 = vpow2.f32 %v64_v4  ;;  %vm72_vm0 = vcmp.gt.f32.partialorder %v569_v11, 0.0  ;;  %v132_v18 = vadd.f32 1e-06, %v569_v11  ;;  %v105_v19 = vadd.f32 1e-06, %v43_v6  ;;  %v62_v21 = vld [vmem:[#allocation5 + $0x50] sm:$0xff] }
  0x2c   :  { %377 = vpow2.f32 %v53_v8  ;;  %v113_v20 = vadd.f32 1e-06, %v109_v12  ;;  %vm73_vm1 = vcmp.gt.f32.partialorder %v572_v17, 0.0  ;;  %v116_v22 = vsel %vm72_vm0, %v104_v14, %v112_v15  ;;  %v586_v29 = vld [vmem:[#allocation2 + $0x10] sm:$0xff]  ;;  %v50_v32 = vld [vmem:[#allocation5 + $0x38] sm:$0xff]  ;;  %s489_s7 = scalar_lea.vmem %s346_s6, 512 }
  0x2d   :  { %379 = vpow2.f32 %v66_v10  ;;  %v133_v23 = vadd.f32 1e-06, %v572_v17  ;;  %v68_v26 = vmul.f32 1.442695, %v62_v21  ;;  %v134_v37 = vadd.f32 1e-06, %v586_v29  ;;  %p490_p2 = scmp.ne.s32.totalorder %s346_s6, %s489_s7  ;;  %p495_p4 = scmp.lt.s32.totalorder %s489_s7, %s489_s7 }
  0x2e   :  { %381 = vpow2.f32 %v55_v16  ;;  %v117_v25 = vsel %vm73_vm1, %v105_v19, %v113_v20  ;;  %v57_v40 = vmul.f32 1.442695, %v50_v32  ;;  %v309_v42 = vshrl.u32 %v308_v31, 7  ;;  %v44_v43 = vld [vmem:[#allocation5 + $0x10] sm:$0xff]  ;;  %v63_v1 = vld [vmem:[#allocation5 + $0x58] sm:$0xff] }
  0x2f   :  { %383 = vlog2.f32 %v132_v18  ;;  %v608_v45 = vand.u32 127, %v308_v31  ;;  %v110_v50 = vsub.f32 1.0, %v44_v43  ;;  %v106_v58 = vadd.f32 1e-06, %v44_v43  ;;  %v666_v19 = vld [vmem:[#allocation2 + $0x18] sm:$0xff]  ;;  %p496_p5 = por %p495_p4, %p494_p3 }
  0x30   :  { %385 = vlog2.f32 %v116_v22  ;;  %v621_v53 = vmul.u32 512, %v309_v42  ;;  %vm74_vm5 = vcmp.gt.f32.partialorder %v586_v29, 0.0  ;;  %v521_v9 = vmov 0.0  }
  0x31   :  { %387 = vlog2.f32 %v133_v23  ;;  %v312_v57 = vadd.s32 128, %v608_v45  ;;  %v628_v59 = vadd.s32 256, %v608_v45  ;;  %v114_v3 = vadd.f32 1e-06, %v110_v50  ;;  %p497_p6 = pnand %p496_p5, %p490_p2 }
  0x32   :  { %389 = vlog2.f32 %v117_v25  ;;  %v644_v6 = vadd.s32 %v621_v53, %v608_v45  ;;  %v654_v10 = vsel %vm72_vm0, 1.0, %v521_v9  ;;  %v70_v13 = vmul.f32 1.442695, %v63_v1 }
  0x33   :  { %391 = vpow2.f32 %v68_v26  ;;  %v658_v12 = vadd.s32 %v621_v53, %v312_v57  ;;  %v118_v25 = vsel %vm74_vm5, %v106_v58, %v114_v3  ;;  %vm75_vm9 = vcmp.gt.f32.partialorder %v666_v19, 0.0 }
  0x34   :  { %v579_v24 = vpop.eup %373  ;;  %vm323_vm7 = vcmp.lt.s32.totalorder %v644_v6, 1024 }
  0x35   :  { %v376_v27 = vpop.eup %375  ;;  %v584_v28 = vadd.f32 1e-06, %v579_v24  ;;  %v359_v21 = vadd.f32 -1.0, %v579_v24  ;;  %vm324_vm8 = vcmp.lt.s32.totalorder %v658_v12, 1024 }
  0x36   :  { %v588_v30 = vadd.f32 1e-06, %v376_v27  ;;  %v593_v35 = vpop.eup %377 }
  0x37   :  { %vm168_vm2 = vcmp.lt.f32.partialorder %v584_v28, 4.0  ;;  %v172_v33 = vadd.f32 4.0, %v584_v28  ;;  %v248_v34 = vadd.f32 1.0, %v584_v28  ;;  %v256_v36 = vadd.f32 2.0, %v584_v28  ;;  %v380_v38 = vpop.eup %379 }
  0x38   :  { %393 = vrcp.f32 %v588_v30  ;;  %v605_v44 = vpop.eup %381  ;;  %v610_v46 = vadd.f32 1e-06, %v380_v38  ;;  %v613_v47 = vadd.f32 1e-06, %v593_v35  ;;  %v264_v49 = vadd.f32 3.0, %v584_v28 }
  0x39   :  { %v601_v39 = vsel %vm168_vm2, %v172_v33, %v584_v28  ;;  %v252_v41 = vmul.f32 %v248_v34, %v584_v28  ;;  %v618_v51 = vadd.f32 1e-06, %v605_v44  ;;  %v384_v52 = vpop.eup %383  ;;  %v360_v50 = vadd.f32 -1.0, %v593_v35 }
  0x3a   :  { %395 = vlog2.f32 %v601_v39  ;;  %vm169_vm3 = vcmp.lt.f32.partialorder %v613_v47, 4.0  ;;  %v173_v54 = vadd.f32 4.0, %v613_v47  ;;  %v249_v55 = vadd.f32 1.0, %v613_v47  ;;  %v386_v56 = vpop.eup %385 }
  0x3b   :  { %397 = vrcp.f32 %v601_v39  ;;  %v260_v48 = vmul.f32 %v256_v36, %v252_v41  ;;  %v388_v60 = vpop.eup %387  ;;  %v257_v0 = vadd.f32 2.0, %v613_v47  ;;  %vm170_vm4 = vcmp.lt.f32.partialorder %v618_v51, 4.0 }
  0x3c   :  { %399 = vlog2.f32 %v134_v37  ;;  %v633_v62 = vsel %vm169_vm3, %v173_v54, %v613_v47  ;;  %v253_v63 = vmul.f32 %v249_v55, %v613_v47  ;;  %v637_v2 = vpop.eup %389  ;;  %v174_v4 = vadd.f32 4.0, %v618_v51 }
  0x3d   :  { %401 = vpow2.f32 %v57_v40  ;;  %v268_v61 = vmul.f32 %v264_v49, %v260_v48  ;;  %v392_v5 = vpop.eup %391  ;;  %v250_v7 = vadd.f32 1.0, %v618_v51  ;;  %v265_v16 = vadd.f32 3.0, %v613_v47 }
  0x3e   :  { %403 = vlog2.f32 %v588_v30  ;;  %v261_v15 = vmul.f32 %v257_v0, %v253_v63  ;;  %v664_v18 = vsel %vm170_vm4, %v174_v4, %v618_v51  ;;  %v137_v22 = vmul.f32 0.6931472, %v384_v52 }
  0x3f   :  { %405 = vrcp.f32 %v610_v46  ;;  %v669_v23 = vadd.f32 1e-06, %v392_v5  ;;  %v254_v31 = vmul.f32 %v250_v7, %v618_v51  ;;  %v258_v32 = vadd.f32 2.0, %v618_v51 }
  0x40   :  { %407 = vlog2.f32 %v633_v62  ;;  %v363_v36 = vadd.f32 -0.5, %v601_v39  ;;  %v682_v37 = vadd.f32 1e-06, %v666_v19  ;;  %v269_v42 = vmul.f32 %v265_v16, %v261_v15 }
  0x41   :  { %409 = vrcp.f32 %v633_v62  ;;  %v688_v48 = vmul.f32 0.6931472, %v386_v56  ;;  %v690_v49 = vmul.f32 %v359_v21, %v137_v22  ;;  %v139_v52 = vmul.f32 0.6931472, %v388_v60 }
  0x42   :  { %v649_v8 = vpop.eup %393  ;;  %411 = vlog2.f32 %v610_v46  ;;  %v262_v55 = vmul.f32 %v258_v32, %v254_v31  ;;  %v266_v57 = vadd.f32 3.0, %v618_v51  ;;  %v356_v47 = vsel %vm73_vm1, 1.0, %v521_v9 }
  0x43   :  { %413 = vlog2.f32 %v268_v61  ;;  %v92_v40 = vmul.f32 %v649_v8, %v588_v30  ;;  %v361_v61 = vadd.f32 -1.0, %v605_v44  ;;  %v703_v16 = vmul.f32 %v360_v50, %v139_v52 }
  0x44   :  { %v396_v14 = vpop.eup %395  ;;  %415 = vlog2.f32 %v664_v18  ;;  %v270_v21 = vmul.f32 %v266_v57, %v262_v55 }
  0x45   :  { %v398_v20 = vpop.eup %397  ;;  %v181_v34 = vmul.f32 0.6931472, %v396_v14  ;;  %417 = vrcp.f32 %v664_v18  ;;  %v96_v0 = vsub.f32 2.0, %v92_v40 }
  0x46   :  { %v400_v26 = vpop.eup %399  ;;  %v192_v27 = vmul.f32 %v398_v20, %v601_v39  ;;  %419 = vlog2.f32 %v118_v25 }
  0x47   :  { %v677_v33 = vpop.eup %401  ;;  %421 = vrcp.f32 %v669_v23  ;;  %v232_v30 = vmul.f32 %v363_v36, %v181_v34  ;;  %v141_v63 = vmul.f32 0.6931472, %v400_v26  ;;  %v100_v31 = vmul.f32 %v649_v8, %v96_v0 }
  0x48   :  { %v404_v38 = vpop.eup %403  ;;  %v196_v41 = vsub.f32 2.0, %v192_v27  ;;  %423 = vlog2.f32 %v669_v23  ;;  %v701_v7 = vadd.f32 1e-06, %v677_v33 }
  0x49   :  { %v686_v43 = vpop.eup %405  ;;  %v149_v1 = vmul.f32 0.6931472, %v404_v38  ;;  %425 = vlog2.f32 %v269_v42  ;;  %v236_v22 = vsub.f32 %v232_v30, %v601_v39  ;;  %v707_v27 = vmul.f32 %v361_v61, %v141_v63 }
  0x4a   :  { %v200_v54 = vmul.f32 %v398_v20, %v196_v41  ;;  %v408_v58 = vpop.eup %407  ;;  %v93_v60 = vmul.f32 %v686_v43, %v610_v46  ;;  %427 = vpow2.f32 %v70_v13  ;;  %v364_v20 = vadd.f32 -0.5, %v633_v62 }
  0x4b   :  { %v410_v56 = vpop.eup %409  ;;  %v183_v25 = vmul.f32 0.6931472, %v408_v58  ;;  %v156_v13 = vmul.f32 %v579_v24, %v149_v1  ;;  %v175_v42 = vadd.f32 4.0, %v701_v7  ;;  %429 = vlog2.f32 %v270_v21 }
  0x4c   :  { %v204_v3 = vmul.f32 %v200_v54, %v200_v54  ;;  %v412_v4 = vpop.eup %411  ;;  %v193_v5 = vmul.f32 %v410_v56, %v633_v62  ;;  %v97_v40 = vsub.f32 2.0, %v93_v60  ;;  %vm171_vm6 = vcmp.lt.f32.partialorder %v701_v7, 4.0 }
  0x4d   :  { %v414_v14 = vpop.eup %413  ;;  %v151_v34 = vmul.f32 0.6931472, %v412_v4  ;;  %v240_v55 = vadd.f32 0.9189385, %v236_v22  ;;  %v233_v57 = vmul.f32 %v364_v20, %v183_v25  ;;  %v365_v24 = vadd.f32 -0.5, %v664_v18 }
  0x4e   :  { %v208_v15 = vmul.f32 0.0007936508, %v204_v3  ;;  %v197_v26 = vsub.f32 2.0, %v193_v5  ;;  %v416_v46 = vpop.eup %415  ;;  %v273_v38 = vmul.f32 0.6931472, %v414_v14  ;;  %v160_v30 = vsub.f32 %v690_v49, %v156_v13 }
  0x4f   :  { %v418_v36 = vpop.eup %417  ;;  %v185_v63 = vmul.f32 0.6931472, %v416_v46  ;;  %v292_v1 = vmul.f32 %v100_v31, %v569_v11  ;;  %v725_v60 = vsel %vm171_vm6, %v175_v42, %v701_v7  ;;  %v101_v49 = vmul.f32 %v686_v43, %v97_v40 }
  0x50   :  { %v212_v32 = vsub.f32 0.0027777778, %v208_v15  ;;  %v201_v41 = vmul.f32 %v410_v56, %v197_v26  ;;  %v712_v50 = vpop.eup %419  ;;  %v194_v52 = vmul.f32 %v418_v36, %v664_v18  ;;  %v280_v15 = vsel %vm168_vm2, %v273_v38, 0.0 }
  0x51   :  { %v717_v58 = vpop.eup %421  ;;  %v237_v11 = vsub.f32 %v233_v57, %v633_v62  ;;  %431 = vlog2.f32 %v725_v60  ;;  %v234_v46 = vmul.f32 %v365_v24, %v185_v63  ;;  %v251_v43 = vadd.f32 1.0, %v701_v7 }
  0x52   :  { %v216_v39 = vmul.f32 %v212_v32, %v204_v3  ;;  %v205_v8 = vmul.f32 %v201_v41, %v201_v41  ;;  %v198_v56 = vsub.f32 2.0, %v194_v52  ;;  %v424_v0 = vpop.eup %423  ;;  %v157_v3 = vmul.f32 %v593_v35, %v151_v34 }
  0x53   :  { %v426_v5 = vpop.eup %425  ;;  %v94_v35 = vmul.f32 %v717_v58, %v669_v23  ;;  %433 = vrcp.f32 %v725_v60  ;;  %v153_v31 = vmul.f32 0.6931472, %v424_v0  ;;  %v259_v62 = vadd.f32 2.0, %v701_v7 }
  0x54   :  { %v220_v61 = vsub.f32 0.083333336, %v216_v39  ;;  %v209_v4 = vmul.f32 0.0007936508, %v205_v8  ;;  %v202_v20 = vmul.f32 %v418_v36, %v198_v56  ;;  %v428_v21 = vpop.eup %427  ;;  %v275_v28 = vmul.f32 0.6931472, %v426_v5 }
  0x55   :  { %v736_v34 = vadd.f32 1e-06, %v428_v21  ;;  %v241_v23 = vadd.f32 0.9189385, %v237_v11  ;;  %v255_v38 = vmul.f32 %v251_v43, %v701_v7  ;;  %v267_v40 = vadd.f32 3.0, %v701_v7  ;;  %v430_v42 = vpop.eup %429 }
  0x56   :  { %v224_v14 = vmul.f32 %v220_v61, %v200_v54  ;;  %v213_v22 = vsub.f32 0.0027777778, %v209_v4  ;;  %v206_v26 = vmul.f32 %v202_v20, %v202_v20  ;;  %435 = vlog2.f32 %v682_v37 }
  0x57   :  { %v98_v24 = vsub.f32 2.0, %v94_v35  ;;  %v263_v61 = vmul.f32 %v259_v62, %v255_v38  ;;  %v281_v56 = vsel %vm169_vm3, %v275_v28, 0.0  ;;  %437 = vrcp.f32 %v736_v34 }
  0x58   :  { %v244_v25 = vadd.f32 %v240_v55, %v224_v14  ;;  %v217_v54 = vmul.f32 %v213_v22, %v205_v8  ;;  %v210_v32 = vmul.f32 0.0007936508, %v206_v26  ;;  %v238_v55 = vsub.f32 %v234_v46, %v664_v18  ;;  %v45_v14 = vld [vmem:[#allocation5 + $0x18] sm:$0xff] }
  0x59   :  { %v161_v8 = vsub.f32 %v703_v16, %v157_v3  ;;  %v277_v5 = vmul.f32 0.6931472, %v430_v42  ;;  %v271_v18 = vmul.f32 %v267_v40, %v263_v61  ;;  %439 = vlog2.f32 %v736_v34 }
  0x5a   :  { %v284_v13 = vsub.f32 %v244_v25, %v280_v15  ;;  %v221_v36 = vsub.f32 0.083333336, %v217_v54  ;;  %v214_v52 = vsub.f32 0.0027777778, %v210_v32  ;;  %v242_v16 = vadd.f32 0.9189385, %v238_v55 }
  0x5b   :  { %v293_v3 = vmul.f32 %v101_v49, %v572_v17  ;;  %v102_v22 = vmul.f32 %v717_v58, %v98_v24  ;;  %v111_v11 = vsub.f32 1.0, %v45_v14  ;;  %v282_v25 = vsel %vm170_vm4, %v277_v5, 0.0 }
  0x5c   :  { %v288_v39 = vsub.f32 %v160_v30, %v284_v13  ;;  %v225_v57 = vmul.f32 %v221_v36, %v201_v41  ;;  %v218_v0 = vmul.f32 %v214_v52, %v206_v26  ;;  %v158_v30 = vmul.f32 %v605_v44, %v153_v31  ;;  %v432_v41 = vpop.eup %431 }
  0x5d   :  { %v434_v44 = vpop.eup %433  ;;  %441 = vlog2.f32 %v271_v18  ;;  %v123_v46 = vmul.f32 0.6931472, %v637_v2  ;;  %v366_v58 = vadd.f32 -0.5, %v725_v60  ;;  %v294_v51 = vmul.f32 %v102_v22, %v586_v29 }
  0x5e   :  { %v296_v63 = vsub.f32 %v288_v39, %v292_v1  ;;  %v245_v4 = vadd.f32 %v241_v23, %v225_v57  ;;  %v222_v15 = vsub.f32 0.083333336, %v218_v0  ;;  %v195_v6 = vmul.f32 %v434_v44, %v725_v60 }
  0x5f   :  { %v162_v54 = vsub.f32 %v707_v27, %v158_v30  ;;  %v107_v13 = vadd.f32 1e-06, %v45_v14  ;;  %v115_v32 = vadd.f32 1e-06, %v111_v11  ;;  %v318_v27 = vadd.s32 %v621_v53, %v628_v59 }
  0x60   :  { %v300_v37 = vmul.f32 %v654_v10, %v296_v63  ;;  %v285_v1 = vsub.f32 %v245_v4, %v281_v56  ;;  %v226_v10 = vmul.f32 %v222_v15, %v202_v20  ;;  %v199_v28 = vsub.f32 2.0, %v195_v6  ;;  %v436_v20 = vpop.eup %435 }
  0x61   :  { %v438_v36 = vpop.eup %437  ;;  %v357_v38 = vsel %vm74_vm5, 1.0, %v521_v9  ;;  %v125_v52 = vmul.f32 0.6931472, %v712_v50  ;;  %v119_v57 = vsel %vm75_vm9, %v107_v13, %v115_v32  ;;  %vm325_vm10 = vcmp.lt.s32.totalorder %v318_v27, 1024 }
  0x62   :  { %v304_v21 = vadd.f32 %v300_v37, %v688_v48  ;;  %v289_v35 = vsub.f32 %v161_v8, %v285_v1  ;;  %v246_v17 = vadd.f32 %v242_v16, %v226_v10  ;;  %v187_v48 = vmul.f32 0.6931472, %v432_v41 }
  0x63   :  { %v203_v62 = vmul.f32 %v434_v44, %v199_v28  ;;  %v440_v39 = vpop.eup %439  ;;  %v95_v12 = vmul.f32 %v438_v36, %v736_v34  ;;  %v362_v61 = vadd.f32 -1.0, %v677_v33  ;;  %v143_v63 = vmul.f32 0.6931472, %v436_v20 }
  0x64   :  { %v327_v26 = vsel %vm323_vm7, %v304_v21, 0.0  ;;  %v297_v49 = vsub.f32 %v289_v35, %v293_v3  ;;  %v286_v31 = vsub.f32 %v246_v17, %v282_v25  ;;  %v235_v42 = vmul.f32 %v366_v58, %v187_v48 }
  0x65   :  { %335 = vst [vmem:[#allocation7] sm:$0xff] %v327_v26  ;;  %v207_v40 = vmul.f32 %v203_v62, %v203_v62  ;;  %v155_v56 = vmul.f32 0.6931472, %v440_v39  ;;  %443 = vlog2.f32 %v119_v57  ;;  %v99_v30 = vsub.f32 2.0, %v95_v12 }
  0x66   :  { %v301_v43 = vmul.f32 %v356_v47, %v297_v49  ;;  %v290_v2 = vsub.f32 %v162_v54, %v286_v31  ;;  %v239_v4 = vsub.f32 %v235_v42, %v725_v60  ;;  %v147_v18 = vmul.f32 %v362_v61, %v143_v63 }
  0x67   :  { %v211_v59 = vmul.f32 0.0007936508, %v207_v40  ;;  %v442_v29 = vpop.eup %441  ;;  %v159_v37 = vmul.f32 %v677_v33, %v155_v56  ;;  %v103_v41 = vmul.f32 %v438_v36, %v99_v30  ;;  %v314_v60 = vadd.s32 384, %v608_v45 }
  0x68   :  { %v305_v23 = vadd.f32 %v301_v43, %v123_v46  ;;  %v298_v55 = vsub.f32 %v290_v2, %v294_v51  ;;  %v279_v14 = vmul.f32 0.6931472, %v442_v29  ;;  %v243_v16 = vadd.f32 0.9189385, %v239_v4 }
  0x69   :  { %v215_v0 = vsub.f32 0.0027777778, %v211_v59  ;;  %v163_v3 = vsub.f32 %v147_v18, %v159_v37  ;;  %v295_v22 = vmul.f32 %v103_v41, %v666_v19  ;;  %v358_v33 = vsel %vm75_vm9, 1.0, %v521_v9 }
  0x6a   :  { %v328_v8 = vsel %vm324_vm8, %v305_v23, 0.0  ;;  %v302_v24 = vmul.f32 %v357_v38, %v298_v55  ;;  %v283_v1 = vsel %vm171_vm6, %v279_v14, 0.0  ;;  %v319_v35 = vadd.s32 %v621_v53, %v314_v60 }
  0x6b   :  { %336 = vst [vmem:[#allocation7 + $0x8] sm:$0xff] %v328_v8  ;;  %v219_v5 = vmul.f32 %v215_v0, %v207_v40 }
  0x6c   :  { %v306_v50 = vadd.f32 %v302_v24, %v125_v52  ;;  %vm326_vm11 = vcmp.lt.s32.totalorder %v319_v35, 1024 }
  0x6d   :  { %v223_v15 = vsub.f32 0.083333336, %v219_v5 }
  0x6e   :  { %v329_v34 = vsel %vm325_vm10, %v306_v50, 0.0 }
  0x6f   :  { %337 = vst [vmem:[#allocation7 + $0x10] sm:$0xff] %v329_v34  ;;  %v227_v47 = vmul.f32 %v223_v15, %v203_v62  ;;  %v444_v10 = vpop.eup %443 }
  0x70   :  { %v127_v25 = vmul.f32 0.6931472, %v444_v10 }
  0x71   :  { %v247_v44 = vadd.f32 %v243_v16, %v227_v47 }
  0x73   :  { %v287_v21 = vsub.f32 %v247_v44, %v283_v1 }
  0x75   :  { %v291_v11 = vsub.f32 %v163_v3, %v287_v21 }
  0x77   :  { %v299_v6 = vsub.f32 %v291_v11, %v295_v22 }
  0x79   :  { %v303_v26 = vmul.f32 %v358_v33, %v299_v6 }
  0x7b   :  { %v307_v7 = vadd.f32 %v303_v26, %v127_v25 }
  0x7d   :  { %v330_v45 = vsel %vm326_vm11, %v307_v7, 0.0 }
  0x7e   :  { %338 = vst [vmem:[#allocation7 + $0x18] sm:$0xff] %v330_v45 }
  0x7f   :  { %500 = shalt.err (!%p497_p6)
}
  0x80   :  { %s501_s10 = scalar_lea.hbm %s800_s2, 512 }
  0x81   :  { %p502_p7 = scmp.ne.s32.totalorder %s800_s2, %s501_s10  ;;  %p505_p8 = scmp.lt.u32.totalorder %s501_s10, %s800_s2 }
  0x83   :  { %p507_p9 = pnand %p505_p8, %p502_p7 }
  0x85   :  { %510 = shalt.err (!%p507_p9)
}
  0x86   :  { %348 = dma.vmem_to_hbm [thread:$0]  %s346_s6, 512, %s800_s2, [#allocation4]  }
  0x87   :  { %515 = dma.done.wait [#allocation4], 512  }
  0x88   :  { %516 = vsyncadd [#allocation4], 4294966784 }
  0x89   :  { %352 = vsyncpa [#allocation3], 1 }
  0x8a   :  { %353 = vsyncpa [#allocation6], 1 }
  0x8b   :  { %354 = vsyncpa [#allocation4], 1 }

</bundles_post_ra>
